<compile_context>
chip_gen: v5e
topology: v5e:2x2
jax: 0.10.0
libtpu: 0.0.40
codegen_flags: <defaults>
</compile_context>

<pallas_src>
import functools

import jax
import jax.numpy as jnp
from jax import lax
from jax.experimental import pallas as pl
from jax.experimental.pallas import tpu as pltpu

C_IN = 16    # conv11: 16 -> 3, 3x3, valid (after reflection pad)
C_OUT = 3
K = 3


def _decoder_kernel(x_ref, a_ref, b_ref, o_ref, *, tile_h, w_out):
    # x_ref: (1, 1, C_IN*(tile_h+2), Wp)  padded input tile, channel-major rows
    # a_ref: (K*C_OUT*tile_h, C_IN*(tile_h+2)) banded conv weights
    # b_ref: (C_OUT*tile_h, 1)             bias, repeated per output row
    # o_ref: (1, C_OUT, tile_h, w_out)
    x = x_ref[0, 0]                                           # (C_IN*THp, Wp)
    # Single MXU contraction over (channel, kh) for all three kw taps at once.
    y = jnp.dot(a_ref[...], x, preferred_element_type=jnp.float32)  # (K*MT, Wp)
    mt = C_OUT * tile_h
    # Combine the kw taps with lane shifts 0/1/2 of the padded width.
    acc = (y[0 * mt:1 * mt, 0:w_out]
           + y[1 * mt:2 * mt, 1:1 + w_out]
           + y[2 * mt:3 * mt, 2:2 + w_out])
    acc = jnp.maximum(acc + b_ref[...], 0.0)                  # bias + ReLU once
    # TH % 8 == 0 -> this reshape is layout-preserving (no sublane regroup).
    o_ref[0] = acc.reshape(C_OUT, tile_h, w_out)


def small_decoder_forward(x_nchw, w11, b11, *, tile_h=None):
    """x_nchw: (N, 16, H, W) f32; w11: (3, 16, 3, 3); b11: (3,) -> (N, 3, H, W)."""
    N, C, H, W = x_nchw.shape
    assert C == C_IN
    if tile_h is None:
        tile_h = next((t for t in (64, 32, 16, 8) if H % t == 0), H)
    assert H % tile_h == 0
    n_h = H // tile_h
    thp = tile_h + 2
    wp = W + 2

    # ---- glue: reflection pad + overlapping row-window tiles (halo duplicated
    # in HBM so every Pallas block is an ordinary non-overlapping block) ----
    x_pad = jnp.pad(x_nchw, ((0, 0), (0, 0), (1, 1), (1, 1)), mode="reflect")
    row_idx = jnp.arange(n_h)[:, None] * tile_h + jnp.arange(thp)[None, :]
    x_win = x_pad[:, :, row_idx, :]                           # (N, C, n_h, thp, Wp)
    x_tiles = jnp.transpose(x_win, (0, 2, 1, 3, 4)).reshape(N, n_h, C_IN * thp, wp)

    # ---- banded weight matrix: A[kw, o, h, c, j] = w[o, c, j-h, kw] ----
    shift = jnp.stack(
        [jnp.eye(tile_h, thp, k=kh, dtype=w11.dtype) for kh in range(K)])
    a = jnp.einsum("ocab,ahj->bohcj", w11, shift)             # (kw, o, h, c, j)
    a = a.reshape(K * C_OUT * tile_h, C_IN * thp)
    b_col = jnp.repeat(b11, tile_h).reshape(C_OUT * tile_h, 1)

    kernel = functools.partial(_decoder_kernel, tile_h=tile_h, w_out=W)
    out = pl.pallas_call(
        kernel,
        out_shape=jax.ShapeDtypeStruct((N, C_OUT, H, W), jnp.float32),
        grid_spec=pltpu.PrefetchScalarGridSpec(
            num_scalar_prefetch=0,
            grid=(N, n_h),
            in_specs=[
                pl.BlockSpec((1, 1, C_IN * thp, wp), lambda n, i: (n, i, 0, 0)),
                pl.BlockSpec((K * C_OUT * tile_h, C_IN * thp),
                             lambda n, i: (0, 0)),
                pl.BlockSpec((C_OUT * tile_h, 1), lambda n, i: (0, 0)),
            ],
            out_specs=pl.BlockSpec((1, C_OUT, tile_h, W),
                                   lambda n, i: (n, 0, i, 0)),
        ),
        compiler_params=pltpu.CompilerParams(
            dimension_semantics=("parallel", "parallel")),
    )(x_tiles, a, b_col)
    return out


def reference_forward(x_nchw, w11, b11):
    """Pure-JAX reference matching the torch module: relu(conv(pad(x)))."""
    xp = jnp.pad(x_nchw, ((0, 0), (0, 0), (1, 1), (1, 1)), mode="reflect")
    y = lax.conv_general_dilated(
        xp, w11, window_strides=(1, 1), padding="VALID",
        dimension_numbers=("NCHW", "OIHW", "NCHW"),
        precision=lax.Precision.HIGHEST)
    return jnp.maximum(y + b11.reshape(1, C_OUT, 1, 1), 0.0)


if __name__ == "__main__":
    key = jax.random.PRNGKey(0)
    k_x, k_w, k_b = jax.random.split(key, 3)

    N, H, W = 2, 16, 16
    x = jax.random.normal(k_x, (N, C_IN, H, W), dtype=jnp.float32)
    # conv11: nn.Conv2d(16, 3, 3) -> weight (3, 16, 3, 3), bias (3,)
    w11 = jax.random.normal(k_w, (C_OUT, C_IN, K, K), dtype=jnp.float32) * 0.2
    b11 = jax.random.normal(k_b, (C_OUT,), dtype=jnp.float32) * 0.1

    # tile_h=8 -> grid (N=2, H/8=2): exercises the spatial grid axis.
    out = small_decoder_forward(x, w11, b11, tile_h=8)
    out = jax.block_until_ready(out)

    ref = reference_forward(x, w11, b11)
    assert out.shape == (N, C_OUT, H, W), out.shape
    err = float(jnp.max(jnp.abs(out - ref)))
    assert jnp.allclose(out, ref, atol=1e-3, rtol=1e-3), err

    print("KERNEL_OK")
</pallas_src>

<mosaic_0001>
module attributes {stable_mosaic.version = 11 : i64} {
  func.func @_decoder_kernel(%arg0: i32, %arg1: i32, %arg2: memref<1x1x160x18xf32, #tpu.memory_space<vmem>>, %arg3: memref<72x160xf32, #tpu.memory_space<vmem>>, %arg4: memref<24x1xf32, #tpu.memory_space<vmem>>, %arg5: memref<1x3x8x16xf32, #tpu.memory_space<vmem>>) attributes {dimension_semantics = [#tpu.dimension_semantics<parallel>, #tpu.dimension_semantics<parallel>], iteration_bounds = array<i64: 2, 2>, scalar_prefetch = 0 : i64, scratch_operands = 0 : i64, tpu.core_type = #tpu.core_type<tc>, window_params = [{transform_indices = @transform_0, window_bounds = array<i64: 1, 1, 160, 18>}, {pipeline_mode = #tpu.pipeline_mode<synchronous>, transform_indices = @transform_1, window_bounds = array<i64: 72, 160>}, {pipeline_mode = #tpu.pipeline_mode<synchronous>, transform_indices = @transform_2, window_bounds = array<i64: 24, 1>}, {transform_indices = @transform_3, window_bounds = array<i64: 1, 3, 8, 16>}]} {
    %c0 = arith.constant 0 : index
    %c0_0 = arith.constant 0 : index
    %c0_1 = arith.constant 0 : index
    %c0_2 = arith.constant 0 : index
    %0 = vector.load %arg2[%c0, %c0_0, %c0_1, %c0_2] : memref<1x1x160x18xf32, #tpu.memory_space<vmem>>, vector<1x1x160x18xf32>
    %1 = vector.shape_cast %0 : vector<1x1x160x18xf32> to vector<160x18xf32>
    %c0_3 = arith.constant 0 : index
    %c0_4 = arith.constant 0 : index
    %2 = vector.load %arg3[%c0_3, %c0_4] : memref<72x160xf32, #tpu.memory_space<vmem>>, vector<72x160xf32>
    %cst = arith.constant dense<0.000000e+00> : vector<72x18xf32>
    %3 = tpu.matmul %2, %1, %cst {dimension_numbers = #tpu.dot_dimension_numbers<[1], [0], [0], [1], [0, 0, 1, 1], [], []>} : vector<72x160xf32>, vector<160x18xf32>, vector<72x18xf32> -> vector<72x18xf32>
    %4 = vector.extract_strided_slice %3 {offsets = [0, 0], sizes = [24, 16], strides = [1, 1]} : vector<72x18xf32> to vector<24x16xf32>
    %5 = vector.extract_strided_slice %3 {offsets = [24, 1], sizes = [24, 16], strides = [1, 1]} : vector<72x18xf32> to vector<24x16xf32>
    %6 = arith.addf %4, %5 : vector<24x16xf32>
    %7 = vector.extract_strided_slice %3 {offsets = [48, 2], sizes = [24, 16], strides = [1, 1]} : vector<72x18xf32> to vector<24x16xf32>
    %8 = arith.addf %6, %7 : vector<24x16xf32>
    %c0_5 = arith.constant 0 : index
    %c0_6 = arith.constant 0 : index
    %9 = vector.load %arg4[%c0_5, %c0_6] : memref<24x1xf32, #tpu.memory_space<vmem>>, vector<24x1xf32>
    %10 = vector.broadcast %9 : vector<24x1xf32> to vector<24x16xf32>
    %11 = arith.addf %8, %10 : vector<24x16xf32>
    %cst_7 = arith.constant 0.000000e+00 : f32
    %12 = vector.broadcast %cst_7 : f32 to vector<24x16xf32>
    %13 = arith.maximumf %11, %12 : vector<24x16xf32>
    %14 = vector.shape_cast %13 : vector<24x16xf32> to vector<3x8x16xf32>
    %c0_8 = arith.constant 0 : index
    %c0_9 = arith.constant 0 : index
    %c0_10 = arith.constant 0 : index
    %c0_11 = arith.constant 0 : index
    %15 = vector.load %arg5[%c0_8, %c0_9, %c0_10, %c0_11] : memref<1x3x8x16xf32, #tpu.memory_space<vmem>>, vector<1x3x8x16xf32>
    %16 = vector.shape_cast %15 : vector<1x3x8x16xf32> to vector<3x8x16xf32>
    %17 = vector.shape_cast %14 : vector<3x8x16xf32> to vector<1x3x8x16xf32>
    tpu.vector_store %arg5[%c0_8, %c0_9, %c0_10, %c0_11], %17 {strides = array<i32>} : memref<1x3x8x16xf32, #tpu.memory_space<vmem>>, vector<1x3x8x16xf32>,
    return
  }
  func.func @transform_0(%arg0: i32, %arg1: i32) -> (i32, i32, i32, i32) {
    %c0_i32 = arith.constant 0 : i32
    %c0_i32_0 = arith.constant 0 : i32
    %c0_i32_1 = arith.constant 0 : i32
    return %arg0, %arg1, %c0_i32, %c0_i32_0 : i32, i32, i32, i32
  }
  func.func @transform_1(%arg0: i32, %arg1: i32) -> (i32, i32) {
    %c0_i32 = arith.constant 0 : i32
    %c0_i32_0 = arith.constant 0 : i32
    %c0_i32_1 = arith.constant 0 : i32
    return %c0_i32, %c0_i32_0 : i32, i32
  }
  func.func @transform_2(%arg0: i32, %arg1: i32) -> (i32, i32) {
    %c0_i32 = arith.constant 0 : i32
    %c0_i32_0 = arith.constant 0 : i32
    %c0_i32_1 = arith.constant 0 : i32
    return %c0_i32, %c0_i32_0 : i32, i32
  }
  func.func @transform_3(%arg0: i32, %arg1: i32) -> (i32, i32, i32, i32) {
    %c0_i32 = arith.constant 0 : i32
    %c0_i32_0 = arith.constant 0 : i32
    %c0_i32_1 = arith.constant 0 : i32
    return %arg0, %c0_i32, %arg1, %c0_i32_0 : i32, i32, i32, i32
  }
}

</mosaic_0001>

<bundles_post_ra>
// kernel: tpu_custom_call.1
= control target key start
LH: loop header
LB: loop body
LE: loop exit
PB: predicated region body
PF: predicated region fallthrough
CT: control target
= control target key end

     0   :  { %8 = vsyncpa [#allocation3], 0  ;;  %s1009_s0 = inlined_call_operand.vmem [shape: f32[2,2,160,18], index: 0, kind: input, shape index: {}]   ;;  %s1010_s1 = inlined_call_operand.vmem [shape: f32[72,160], index: 1, kind: input, shape index: {}]   ;;  %s1011_s2 = inlined_call_operand.vmem [shape: f32[24,1], index: 2, kind: input, shape index: {}]   ;;  %s1012_s3 = inlined_call_operand.hbm [shape: f32[2,3,16,16], index: 3, kind: output, shape index: {}]  }
   0x1   :  { %10 = vsyncpa [#allocation3 + $0x1], 0  ;;  %s770_s12 = smov 0   ;;  %s772_s13 = smov 0  }
   0x2   :  { %s774_s14 = smov 0   ;;  %s776_s15 = smov 0  }
   0x3   :  { %s778_s16 = smov 0   ;;  %s780_s17 = smov 0  }
   0x4   :  { %s782_s18 = smov 0   ;;  %s784_s19 = smov 0  }
   0x5 LB: > { %s510_s20 = sadd.s32 4294967295, %s742_s19   ;;  %s511_s21 = sadd.s32 4294967294, %s742_s19   ;;  %s742_s19 = sphi %s784_s19, %s16_s19   ;;  %s738_s18 = sphi %s782_s18, %s1021_s18   ;;  %s734_s17 = sphi %s780_s17, %s1020_s17   ;;  %s730_s16 = sphi %s778_s16, %s1019_s16   ;;  %s726_s15 = sphi %s776_s15, %s1018_s15   ;;  %s722_s14 = sphi %s774_s14, %s1017_s14   ;;  %s718_s13 = sphi %s772_s13, %s1016_s13   ;;  %s714_s12 = sphi %s770_s12, %s1015_s12  }
   0x6   : > { %s25_s22 = sadd.s32 1, %s734_s17  ;;  %s28_s23 = sadd.s32 1, %s738_s18 }
   0x7   : > { %p26_p0 = scmp.ge.s32.totalorder %s25_s22, 2  ;;  %p117_p1 = scmp.ne.s32.totalorder %s722_s14, %s718_s13 }
   0x8   : > { %p118_p2 = scmp.eq.s32.totalorder %s510_s20, 3  ;;  %p123_p5 = scmp.ne.s32.totalorder %s718_s13, %s714_s12 }
   0x9   : > { %s1023_s22 = smov (%p26_p0, %s25_s22), 0  ;;  %s1025_s23 = smov (!%p26_p0, %s28_s23), %s738_s18 }
   0xa   : > { %s103_s24 = ssub.s32 %s734_s17, %s1023_s22  ;;  %p821_p3 = por %p118_p2, %p117_p1 }
   0xb   : > { %p30_p4 = scmp.ge.s32.totalorder %s1025_s23, 2  ;;  %p124_p6 = scmp.eq.s32.totalorder %s511_s21, 3 }
   0xc   : > { %p514_p7 = scmp.ge.s32.totalorder %s742_s19, 1  ;;  %p160_p9 = scmp.lt.s32.totalorder %s742_s19, 5 }
   0xd   : > { %s1027_s23 = smov (%p30_p4, %s1025_s23), 0  ;;  %p830_p8 = por %p124_p6, %p123_p5 }
   0xe   : > { %s102_s27 = ssub.s32 %s738_s18, %s1027_s23  ;;  %s107_s28 = sadd.s32 1, %s722_s14 }
   0xf   : > { %s104_s29 = sor.u32 %s103_s24, %s102_s27  ;;  %p161_p10 = pnand %p514_p7, %p160_p9 }
  0x10   : > { %p105_p11 = scmp.eq.s32.totalorder %s104_s29, 0  ;;  %p188_p12 = scmp.lt.s32.totalorder (!%p161_p10), %s730_s16, 1 }
  0x11   : > { %164 = sbr.rel (%p161_p10) target bundleno = 348 (0x15c), region = 32  ;;  %p190_p13 = scmp.lt.s32.totalorder (!%p161_p10), %s726_s15, 1 }
  0x12   : > { %s839_s30 = scalar_select %p105_p11, %s722_s14, %s107_s28  }
  0x13   : > { %s185_s27 = sand.u32 (!%p161_p10), 1, %s718_s13   ;;  %s567_s28 = smul.u32 (!%p161_p10), 6, %s730_s16 }
  0x14   : > { %s564_s29 = smul.u32 (!%p161_p10), 24, %s185_s27  ;;  %s410_s10 = scalar_lea.sflag (!%p161_p10), [#allocation3], %s185_s27 }
  0x16   : > { %s189_s4 = scalar_select %p188_p12, %s730_s16, 1  ;;  %v218_v8 = vld [vmem:[%s1010_s1 + $0x8] sm:$0xff]  ;;  %vm235_vm0 = vcmask 261120   ;;  %v220_v13 = vld [vmem:[%s1010_s1 + $0x18] sm:$0xff]  ;;  %v217_v23 = vld [vmem:[%s1010_s1] sm:$0xff]  ;;  %v744_v44 = vmov 0  }
  0x17   : > { %s191_s5 = scalar_select %p190_p13, %s726_s15, 1  ;;  %v222_v18 = vld [vmem:[%s1010_s1 + $0x28] sm:$0xff]  ;;  %v225_v24 = vld [vmem:[%s1010_s1 + $0x40] sm:$0xff]  ;;  %v224_v26 = vld [vmem:[%s1010_s1 + $0x38] sm:$0xff]  ;;  %646 = vset.pattern.permute.xlu1 %v744_v44  ;;  %645 = vset.pattern.permute.xlu0 %v744_v44  ;;  %vm405_vm1 = vcmask 130048  }
  0x18   : > { %s566_s6 = smul.u32 40, %s189_s4  ;;  %v233_v25 = vld [vmem:[%s1010_s1 + $0x80] sm:$0xff]  ;;  %v219_v27 = vld [vmem:[%s1010_s1 + $0x10] sm:$0xff]  ;;  %v226_v29 = vld [vmem:[%s1010_s1 + $0x48] sm:$0xff]  ;;  %647 = vset.pattern.permute.xlu2 %v744_v44  ;;  %s420_s4 = sadd.s32 %s726_s15, %s567_s28 }
  0x19   : > { %s565_s7 = smul.u32 20, %s191_s5  ;;  %v227_v28 = vld [vmem:[%s1010_s1 + $0x50] sm:$0xff]  ;;  %v230_v30 = vld [vmem:[%s1010_s1 + $0x68] sm:$0xff]  ;;  %v221_v31 = vld [vmem:[%s1010_s1 + $0x20] sm:$0xff]  ;;  %s525_s5 = sshll.u32 %s420_s4, 3 }
  0x1a   : > { %v229_v32 = vld [vmem:[%s1010_s1 + $0x60] sm:$0xff]  ;;  %v228_v33 = vld [vmem:[%s1010_s1 + $0x58] sm:$0xff]  ;;  %v223_v35 = vld [vmem:[%s1010_s1 + $0x30] sm:$0xff]  ;;  %s422_s16 = scalar_lea.hbm %s1012_s3, %s525_s5  ;;  %s668_s28 = scalar_lea.hbm %s1012_s3, 96 }
  0x1b   : > { %s194_s8 = sadd.s32 %s566_s6, %s565_s7  ;;  %v232_v34 = vld [vmem:[%s1010_s1 + $0x78] sm:$0xff]  ;;  %v231_v36 = vld [vmem:[%s1010_s1 + $0x70] sm:$0xff]  ;;  %v234_v37 = vld [vmem:[%s1010_s1 + $0x88] sm:$0xff]  ;;  %s745_s7 = smov 127  }
  0x1c   : > { %s515_s9 = sshll.u32 %s194_s8, 3  ;;  %s746_s8 = smov 126  }
  0x1d   : > { %s848_s20 = scalar_lea.vmem %s1009_s0, %s515_s9  ;;  %s187_s6 = scalar_lea.vmem [#allocation2], %s564_s29 }
  0x1e   : > { %v212_v0 = vld [vmem:[%s848_s20 + $0x78] sm:$0xff]  ;;  %v211_v2 = vld [vmem:[%s848_s20 + $0x70] sm:$0xff]  ;;  %v210_v4 = vld [vmem:[%s848_s20 + $0x68] sm:$0xff]  ;;  %s423_s9 = sshll.u32 %s187_s6, 4  ;;  %s425_s15 = sshll.u32 %s422_s16, 4  ;;  %s424_s9 = int_to_ptr.vmem [resolvable:$true] %s423_s9  ;;  %s426_s15 = int_to_ptr.hbm [resolvable:$true] %s425_s15 }
  0x1f   : > { %v852_v1 = vld [vmem:[%s848_s20 + $0x98] sm:$0xff]  ;;  %263 = vmatpush.msra.mxu0 %v212_v0  ;;  %528 = vmatpush.msra.mxu2 %v212_v0  ;;  %v856_v3 = vld [vmem:[%s848_s20 + $0x90] sm:$0xff]  ;;  %v861_v5 = vld [vmem:[%s848_s20 + $0x88] sm:$0xff]  ;;  %s662_s11 = sshra.s32 %s426_s15, 4  ;;  %s663_s11 = int_to_ptr.hbm [resolvable:$true] %s662_s11 }
  0x20   : > { %529 = vmatpush.msra.mxu3 %v212_v0  ;;  %319 = vmatpush.msra.mxu1 %v852_v1  ;;  %v209_v6 = vld [vmem:[%s848_s20 + $0x60] sm:$0xff]  ;;  %v208_v9 = vld [vmem:[%s848_s20 + $0x58] sm:$0xff]  ;;  %v207_v10 = vld [vmem:[%s848_s20 + $0x50] sm:$0xff]  ;;  %s664_s21 = scalar_lea.hbm %s663_s11, 24  ;;  %p669_p4 = scmp.lt.s32.totalorder %s663_s11, %s1012_s3 }
  0x21   : > { %264 = vmatpush.msra.mxu0 %v211_v2  ;;  %530 = vmatpush.msra.mxu2 %v211_v2  ;;  %v866_v7 = vld [vmem:[%s848_s20 + $0x80] sm:$0xff]  ;;  %v206_v11 = vld [vmem:[%s848_s20 + $0x48] sm:$0xff]  ;;  %v204_v14 = vld [vmem:[%s848_s20 + $0x38] sm:$0xff]  ;;  %p665_p0 = scmp.ne.s32.totalorder %s663_s11, %s664_s21  ;;  %p670_p5 = scmp.lt.s32.totalorder %s668_s28, %s664_s21 }
  0x22   : > { %531 = vmatpush.msra.mxu3 %v211_v2  ;;  %320 = vmatpush.msra.mxu1 %v856_v3  ;;  %v205_v12 = vld [vmem:[%s848_s20 + $0x40] sm:$0xff]  ;;  %v203_v15 = vld [vmem:[%s848_s20 + $0x30] sm:$0xff]  ;;  %v202_v16 = vld [vmem:[%s848_s20 + $0x28] sm:$0xff] }
  0x23   : > { %265 = vmatpush.msra.mxu0 %v210_v4  ;;  %532 = vmatpush.msra.mxu2 %v210_v4  ;;  %v201_v17 = vld [vmem:[%s848_s20 + $0x20] sm:$0xff]  ;;  %v200_v19 = vld [vmem:[%s848_s20 + $0x18] sm:$0xff]  ;;  %v199_v20 = vld [vmem:[%s848_s20 + $0x10] sm:$0xff]  ;;  %p666_p1 = pnand %p665_p0, %p821_p3  ;;  %p671_p6 = por %p670_p5, %p669_p4 }
  0x24   : > { %533 = vmatpush.msra.mxu3 %v210_v4  ;;  %321 = vmatpush.msra.mxu1 %v861_v5  ;;  %v198_v21 = vld [vmem:[%s848_s20 + $0x8] sm:$0xff]  ;;  %v197_v22 = vld [vmem:[%s848_s20] sm:$0xff]  ;;  %v383_v4 = vld [vmem:[%s1011_s2 + $0x10] sm:$0xff] }
  0x25   : > { %266 = vmatpush.msra.mxu0 %v209_v6  ;;  %534 = vmatpush.msra.mxu2 %v209_v6  ;;  %v381_v0 = vld [vmem:[%s1011_s2] sm:$0xff]  ;;  %p667_p2 = pneg %p666_p1 }
  0x26   : > { %535 = vmatpush.msra.mxu3 %v209_v6  ;;  %322 = vmatpush.msra.mxu1 %v866_v7 }
  0x27   : > { %516 = vmatmul.msk.f32.vlgmr.msra.gmra.mxu1 %vm235_vm0, %v218_v8  ;;  %267 = vmatpush.msra.mxu0 %v208_v9  ;;  %p672_p7 = pnand %p671_p6, %p667_p2 }
  0x28   : > { %536 = vmatpush.msra.mxu2 %v208_v9  ;;  %537 = vmatpush.msra.mxu3 %v208_v9 }
  0x29   : > { %268 = vmatpush.msra.mxu0 %v207_v10 }
  0x2a   : > { %538 = vmatpush.msra.mxu2 %v207_v10  ;;  %539 = vmatpush.msra.mxu3 %v207_v10 }
  0x2b   : > { %269 = vmatpush.msra.mxu0 %v206_v11 }
  0x2c   : > { %540 = vmatpush.msra.mxu2 %v206_v11  ;;  %541 = vmatpush.msra.mxu3 %v206_v11 }
  0x2d   : > { %270 = vmatpush.msra.mxu0 %v205_v12 }
  0x2e   : > { %542 = vmatpush.msra.mxu2 %v205_v12  ;;  %543 = vmatpush.msra.mxu3 %v205_v12 }
  0x2f   : > { %517 = vmatmul.msk.f32.gmra.mxu1 %vm235_vm0, %v220_v13  ;;  %271 = vmatpush.msra.mxu0 %v204_v14 }
  0x30   : > { %544 = vmatpush.msra.mxu2 %v204_v14  ;;  %545 = vmatpush.msra.mxu3 %v204_v14 }
  0x31   : > { %272 = vmatpush.msra.mxu0 %v203_v15 }
  0x32   : > { %546 = vmatpush.msra.mxu2 %v203_v15  ;;  %547 = vmatpush.msra.mxu3 %v203_v15 }
  0x33   : > { %273 = vmatpush.msra.mxu0 %v202_v16 }
  0x34   : > { %548 = vmatpush.msra.mxu2 %v202_v16  ;;  %549 = vmatpush.msra.mxu3 %v202_v16 }
  0x35   : > { %274 = vmatpush.msra.mxu0 %v201_v17 }
  0x36   : > { %550 = vmatpush.msra.mxu2 %v201_v17  ;;  %551 = vmatpush.msra.mxu3 %v201_v17 }
  0x37   : > { %518 = vmatmul.msk.f32.gmra.mxu1 %vm235_vm0, %v222_v18  ;;  %275 = vmatpush.msra.mxu0 %v200_v19 }
  0x38   : > { %552 = vmatpush.msra.mxu2 %v200_v19  ;;  %553 = vmatpush.msra.mxu3 %v200_v19 }
  0x39   : > { %276 = vmatpush.msra.mxu0 %v199_v20 }
  0x3a   : > { %554 = vmatpush.msra.mxu2 %v199_v20  ;;  %555 = vmatpush.msra.mxu3 %v199_v20 }
  0x3b   : > { %277 = vmatpush.msra.mxu0 %v198_v21 }
  0x3c   : > { %556 = vmatpush.msra.mxu2 %v198_v21  ;;  %557 = vmatpush.msra.mxu3 %v198_v21 }
  0x3d   : > { %278 = vmatpush.msra.mxu0 %v197_v22 }
  0x3e   : > { %558 = vmatpush.msra.mxu2 %v197_v22  ;;  %559 = vmatpush.msra.mxu3 %v197_v22 }
  0x3f   : > { %279 = vmatmul.f32.vlgmr.msra.gmra.mxu0 %v217_v23  ;;  %291 = vmatmul.f32.vlgmr.msra.gmra.mxu2 %v225_v24 }
  0x40   : > { %303 = vmatmul.f32.vlgmr.msra.gmra.mxu3 %v233_v25  ;;  %519 = vmatmul.msk.f32.gmra.mxu1 %vm235_vm0, %v224_v26 }
  0x41   : > { %560 = vmatpush.msrb.mxu3 %v852_v1  ;;  %v382_v1 = vld [vmem:[%s1011_s2 + $0x8] sm:$0xff] }
  0x43   : > { %561 = vmatpush.msrb.mxu3 %v856_v3 }
  0x45   : > { %562 = vmatpush.msrb.mxu3 %v861_v5 }
  0x47   : > { %563 = vmatpush.msrb.mxu3 %v866_v7  ;;  %282 = vmatmul.f32.gmra.mxu0 %v219_v27 }
  0x48   : > { %294 = vmatmul.f32.gmra.mxu2 %v227_v28  ;;  %520 = vmatmul.msk.f32.gmra.mxu1 %vm235_vm0, %v226_v29 }
  0x49   : > { %522 = vmatmul.msk.f32.vlgmr.msrb.gmra.mxu3 %vm235_vm0, %v230_v30 }
  0x4f   : > { %285 = vmatmul.f32.gmra.mxu0 %v221_v31 }
  0x50   : > { %297 = vmatmul.f32.gmra.mxu2 %v229_v32  ;;  %521 = vmatmul.msk.f32.gmra.mxu1 %vm235_vm0, %v228_v33 }
  0x51   : > { %523 = vmatmul.msk.f32.gmra.mxu3 %vm235_vm0, %v232_v34 }
  0x57   : > { %288 = vmatmul.f32.gmra.mxu0 %v223_v35 }
  0x58   : > { %300 = vmatmul.f32.gmra.mxu2 %v231_v36 }
  0x59   : > { %524 = vmatmul.msk.f32.gmra.mxu3 %vm235_vm0, %v234_v37 }
  0xa4   : > { %v324_v38 = vpop.f32.mrf.mxu1 }
  0xac   : > { %v327_v39 = vpop.f32.mrf.mxu1 }
  0xb4   : > { %v330_v40 = vpop.f32.mrf.mxu1 }
  0xbc   : > { %v280_v41 = vpop.f32.mrf.mxu0 }
  0xbd   : > { %v325_v42 = vadd.f32 %v324_v38, %v280_v41  ;;  %v333_v43 = vpop.f32.mrf.mxu1 }
  0xc2   : > { %v292_v45 = vpop.f32.mrf.mxu2 }
  0xc3   : > { %v304_v46 = vpop.f32.mrf.mxu3 }
  0xc4   : > { %v283_v47 = vpop.f32.mrf.mxu0 }
  0xc5   : > { %v328_v48 = vadd.f32 %v327_v39, %v283_v47  ;;  %v336_v49 = vpop.f32.mrf.mxu1 }
  0xc6   : > { %v337_v50 = vadd.f32 %v336_v49, %v292_v45 }
  0xc8   : > { %356 = vrot.lane.b32.xlu0 %v337_v50, %s745_s7 }
  0xcb   : > { %v295_v51 = vpop.f32.mrf.mxu2 }
  0xcc   : > { %v286_v52 = vpop.f32.mrf.mxu0  ;;  %v342_v53 = vpop.f32.mrf.mxu3 }
  0xcd   : > { %v331_v54 = vadd.f32 %v330_v40, %v286_v52  ;;  %v339_v55 = vpop.f32.mrf.mxu1 }
  0xce   : > { %v340_v56 = vadd.f32 %v339_v55, %v295_v51 }
  0xd0   : > { %358 = vrot.lane.b32.xlu1 %v340_v56, %s745_s7 }
  0xd3   : > { %v298_v57 = vpop.f32.mrf.mxu2 }
  0xd4   : > { %v343_v58 = vadd.f32 %v342_v53, %v298_v57  ;;  %v289_v59 = vpop.f32.mrf.mxu0  ;;  %v345_v61 = vpop.f32.mrf.mxu3 }
  0xd5   : > { %v334_v60 = vadd.f32 %v333_v43, %v289_v59 }
  0xd7   : > { %354 = vrot.lane.b32.xlu0 %v334_v60, %s745_s7 }
  0xd8   : > { %369 = vrot.lane.b32.xlu1 %v343_v58, %s746_s8 }
  0xdb   : > { %v301_v62 = vpop.f32.mrf.mxu2 }
  0xdc   : > { %v346_v63 = vadd.f32 %v345_v61, %v301_v62  ;;  %v348_v2 = vpop.f32.mrf.mxu3 }
  0xdd   : > { %v349_v3 = vadd.f32 %v348_v2, %v304_v46 }
  0xde   : > { %371 = vrot.lane.b32.xlu2 %v346_v63, %s746_s8 }
  0xdf   : > { %386 = vperm.xlu0 %645, %v381_v0  }
  0xe0   : > { %391 = vperm.xlu1 %646, %v382_v1  }
  0xe6   : > { %373 = vrot.lane.b32.xlu2 %v349_v3, %s746_s8 }
  0xee   : > { %396 = vperm.xlu2 %647, %v383_v4  }
 0x138   : > { %v372_v5 = vpop.permute.xlu2 %371 }
 0x13a   : > { %v357_v7 = vpop.permute.xlu0 %356 }
 0x13b   : > { %v364_v17 = vadd.f32 %v357_v7, %v328_v48 }
 0x13d   : > { %v379_v19 = vadd.f32 %v372_v5, %v364_v17 }
 0x140   : > { %v374_v6 = vpop.permute.xlu2 %373 }
 0x142   : > { %v359_v8 = vpop.permute.xlu1 %358 }
 0x143   : > { %v365_v9 = vadd.f32 %v359_v8, %v331_v54 }
 0x145   : > { %v380_v10 = vadd.f32 %v374_v6, %v365_v9 }
 0x148   : > { %v397_v11 = vpop.permute.xlu2 %396 }
 0x149   : > { %v401_v12 = vadd.f32 %v397_v11, %v380_v10  ;;  %v355_v13 = vpop.permute.xlu0 %354 }
 0x14a   : > { %v370_v14 = vpop.permute.xlu1 %369  ;;  %v363_v16 = vadd.f32 %v355_v13, %v325_v42 }
 0x14b   : > { %v404_v15 = vmax.f32 %v401_v12, 0.0 }
 0x14c   : > { %v378_v18 = vadd.f32 %v370_v14, %v363_v16 }
 0x14d   : > { %408 = vst.msk [vmem:[%s187_s6 + $0x10] sm:$0xff] %vm405_vm1, %v404_v15 }
 0x151   : > { %v387_v20 = vpop.permute.xlu0 %386 }
 0x152   : > { %v392_v21 = vpop.permute.xlu1 %391  ;;  %v399_v22 = vadd.f32 %v387_v20, %v378_v18 }
 0x153   : > { %v400_v23 = vadd.f32 %v392_v21, %v379_v19 }
 0x154   : > { %v402_v24 = vmax.f32 %v399_v22, 0.0 }
 0x155   : > { %v403_v25 = vmax.f32 %v400_v23, 0.0 }
 0x156   : > { %406 = vst.msk [vmem:[%s187_s6] sm:$0xff] %vm405_vm1, %v402_v24 }
 0x157   : > { %407 = vst.msk [vmem:[%s187_s6 + $0x8] sm:$0xff] %vm405_vm1, %v403_v25 }
 0x158   : > { %675 = shalt.err (!%p672_p7)
}
 0x159   : > { %s747_s27 = smov 128   ;;  %s748_s5 = smov 256  }
 0x15a   : > { %s749_s6 = smov 8  }
 0x15b   : > { %568 = dma.vmem_to_hbm [thread:$0]  (%p821_p3), %s424_s9, 384, %s426_s15, %s410_s10, %s747_s27, %s748_s5, %s749_s6  }
 0x15c PF: > { %p574_p9 = scmp.ge.s32.totalorder %s742_s19, 2  ;;  %s440_s7 = sand.u32 1, %s714_s12  }
 0x15d   : > { %s441_s8 = scalar_lea.sflag [#allocation3], %s440_s7 }
 0x15e   : > { %p571_p10 = pnand %p574_p9, %p830_p8 }
 0x160   : > { %p572_p11 = pneg %p571_p10 }
 0x162   : > { %709 = dma.done.wait (%p572_p11), %s441_s8, 384  }
 0x163   : > { %711 = vsyncadd (%p572_p11), %s441_s8, 4294966912  ;;  %s16_s19 = sadd.s32 1, %s742_s19   ;;  %s1015_s12 = smov %s718_s13 }
 0x164   : > { %p13_p12 = scmp.ge.s32.totalorder %s16_s19, 6   ;;  %s1016_s13 = smov %s722_s14 }
 0x165   : > { %s1017_s14 = smov %s839_s30  ;;  %s1018_s15 = smov %s734_s17 }
 0x166   : > { %s1019_s16 = smov %s738_s18  ;;  %s1020_s17 = smov %s1023_s22 }
 0x167   : > { %s1021_s18 = smov %s1027_s23  ;;  %15 = sbr.rel (!%p13_p12) target bundleno = 5 (0x5), region = 67 }
 0x16c   :  { %447 = vsyncpa [#allocation3], 1 }
 0x16d   :  { %449 = vsyncpa [#allocation3 + $0x1], 1 }

</bundles_post_ra>
